<compile_context>
chip_gen: v5e
topology: v5e:2x2
jax: 0.10.0
libtpu: 0.0.40
codegen_flags: <defaults>
</compile_context>

<pallas_src>
import math

import jax
import jax.numpy as jnp
from jax.experimental import pallas as pl
from jax.experimental.pallas import tpu as pltpu

LANES = 128  # TPU lane width; feature dims are padded to multiples of this.


# ---------------- helpers ----------------

def _round_up(x: int, m: int) -> int:
    return (x + m - 1) // m * m


def _pad2d(a, rows: int, cols: int):
    """Zero-pad a 2-D array up to (rows, cols)."""
    if a.shape == (rows, cols):
        return a
    out = jnp.zeros((rows, cols), a.dtype)
    return out.at[: a.shape[0], : a.shape[1]].set(a)


# ---------------- fused Pallas kernel ----------------

def _make_fused_kernel(n_layers: int, skips, compute_dtype):
    """Build a kernel that runs all layers on one (TM, D) row tile."""
    skips = frozenset(skips)

    def kernel(x_ref, z_ref, *refs):
        o_ref = refs[-1]
        prm = refs[:-1]            # flattened per-layer weights/biases
        idx = 0
        y = x_ref[...]             # (TM, din_p) in compute dtype
        zc = z_ref[...]            # (TM, dz_p)  in compute dtype
        for li in range(n_layers):
            if li in skips:
                wy = prm[idx][...]
                wz = prm[idx + 1][...]
                b = prm[idx + 2][...]          # (1, dh_p) f32
                idx += 3
                # relu(cat(y, z) @ [Wy; Wz] + b) == relu(y@Wy + z@Wz + b)
                acc = jnp.dot(y, wy, preferred_element_type=jnp.float32)
                acc = acc + jnp.dot(zc, wz, preferred_element_type=jnp.float32)
            else:
                w = prm[idx][...]
                b = prm[idx + 1][...]
                idx += 2
                acc = jnp.dot(y, w, preferred_element_type=jnp.float32)
            # f32 bias + ReLU epilogue on every generation (v5e VPU has no bf16)
            yf = jnp.maximum(acc + b, 0.0)
            y = yf if li == n_layers - 1 else yf.astype(compute_dtype)
        o_ref[...] = y.astype(o_ref.dtype)

    return kernel


# ---------------- parameter init (PyTorch nn.Linear style) ----------------

def init_params(key, n_layers, input_dim, skip_dim, hidden_dim, input_skips):
    """List of (weight (dout, din), bias (dout,)) per layer, torch.nn.Linear style."""
    skips = set(input_skips)
    params = []
    for li in range(n_layers):
        if li == 0:
            dimin, dimout = input_dim, hidden_dim
        elif li in skips:
            dimin, dimout = hidden_dim + skip_dim, hidden_dim
        else:
            dimin, dimout = hidden_dim, hidden_dim
        key, kw, kb = jax.random.split(key, 3)
        bound = 1.0 / (dimin ** 0.5)
        w = jax.random.uniform(kw, (dimout, dimin), jnp.float32, -bound, bound)
        b = jax.random.uniform(kb, (dimout,), jnp.float32, -bound, bound)
        params.append((w, b))
    return params


# ---------------- one-time weight prep (transpose + split + pad + cast) ----------------

def prepare_params(params, input_skips, input_dim, skip_dim, hidden_dim,
                   compute_dtype=jnp.float32):
    skips = set(input_skips)
    n_layers = len(params)
    assert 0 not in skips, "layer 0 cannot be a skip layer (matches the PyTorch module)"

    din_p = _round_up(input_dim, LANES)
    dz_p = _round_up(skip_dim, LANES)
    dh_p = _round_up(hidden_dim, LANES)

    flat = []
    k_sum = 0  # sum over dots of K_p * Dout_p (for the cost estimate)
    for li, (w, b) in enumerate(params):
        wt = jnp.transpose(w).astype(jnp.float32)          # (din, dout)
        b_p = _pad2d(b.reshape(1, -1).astype(jnp.float32), 1, dh_p)  # bias stays f32
        if li in skips:
            wy = _pad2d(wt[:hidden_dim, :], dh_p, dh_p).astype(compute_dtype)
            wz = _pad2d(wt[hidden_dim:, :], dz_p, dh_p).astype(compute_dtype)
            flat += [wy, wz, b_p]
            k_sum += dh_p * dh_p + dz_p * dh_p
        else:
            kin_p = din_p if li == 0 else dh_p
            wp = _pad2d(wt, kin_p, dh_p).astype(compute_dtype)
            flat += [wp, b_p]
            k_sum += kin_p * dh_p

    return dict(flat=flat, skips=frozenset(skips), n_layers=n_layers,
                din_p=din_p, dz_p=dz_p, dh_p=dh_p, hidden_dim=hidden_dim,
                compute_dtype=compute_dtype, k_sum=k_sum)


# ---------------- forward (single fused pallas_call) ----------------

def mlp_with_input_skips(prep, x, z, *, tm=256):
    # NOTE: tm=256 keeps the resident weights + double-buffered row tiles well
    # under v7x's 64 MiB VMEM; on v5e/v6e (128 MiB) tm=512-1024 is also fine.
    lead = x.shape[:-1]
    n = math.prod(lead) if lead else 1
    cdt = prep["compute_dtype"]
    din_p, dz_p, dh_p = prep["din_p"], prep["dz_p"], prep["dh_p"]

    xf = x.reshape(n, x.shape[-1]).astype(cdt)
    zf = z.reshape(n, z.shape[-1]).astype(cdt)

    tm = min(tm, _round_up(n, 8))
    n_pad = _round_up(n, tm)
    xp = _pad2d(xf, n_pad, din_p)
    zp = _pad2d(zf, n_pad, dz_p)
    grid = (n_pad // tm,)

    in_specs = [
        pl.BlockSpec((tm, din_p), lambda i: (i, 0)),
        pl.BlockSpec((tm, dz_p), lambda i: (i, 0)),
    ]
    # Weights/biases: full-array blocks, constant index_map -> stay resident in
    # VMEM (no re-DMA across row tiles).
    for p in prep["flat"]:
        in_specs.append(pl.BlockSpec(p.shape, lambda i: (0, 0)))

    out_specs = pl.BlockSpec((tm, dh_p), lambda i: (i, 0))

    kernel = _make_fused_kernel(prep["n_layers"], prep["skips"], cdt)

    itemsize = jnp.dtype(cdt).itemsize
    bytes_accessed = (
        xp.size * itemsize + zp.size * itemsize
        + sum(int(p.size) * jnp.dtype(p.dtype).itemsize for p in prep["flat"])
        + n_pad * dh_p * 4
    )
    cost = pl.CostEstimate(
        flops=2 * n_pad * prep["k_sum"],
        transcendentals=0,
        bytes_accessed=int(bytes_accessed),
    )

    out = pl.pallas_call(
        kernel,
        out_shape=jax.ShapeDtypeStruct((n_pad, dh_p), jnp.float32),
        grid=grid,
        in_specs=in_specs,
        out_specs=out_specs,
        compiler_params=pltpu.CompilerParams(dimension_semantics=("parallel",)),
        cost_estimate=cost,
    )(xp, zp, *prep["flat"])

    return out[:n, : prep["hidden_dim"]].reshape(*lead, prep["hidden_dim"])


# ---------------- pure-JAX reference (mirrors the PyTorch forward) ----------------

def mlp_with_input_skips_ref(params, input_skips, x, z):
    skips = set(input_skips)
    y = x
    for li, (w, b) in enumerate(params):
        if li in skips:
            y = jnp.concatenate((y, z), axis=-1)
        y = jnp.maximum(jnp.einsum('...i,oi->...o', y, w) + b, 0.0)
    return y


# ---------------- main ----------------

if __name__ == "__main__":
    n_layers = 4
    input_dim = 16
    output_dim = 32      # unused by the torch module's forward (all layers emit hidden_dim)
    skip_dim = 16
    hidden_dim = 32
    input_skips = (2,)

    key = jax.random.PRNGKey(0)
    kp, kx, kz = jax.random.split(key, 3)

    params = init_params(kp, n_layers, input_dim, skip_dim, hidden_dim, input_skips)

    x = jax.random.normal(kx, (2, 8, input_dim), jnp.float32)
    z = jax.random.normal(kz, (2, 8, skip_dim), jnp.float32)

    ref = mlp_with_input_skips_ref(params, input_skips, x, z)

    # f32 matmul path: exact structural match, tight tolerance.
    prep_f32 = prepare_params(params, input_skips, input_dim, skip_dim, hidden_dim,
                              compute_dtype=jnp.float32)
    out_f32 = jax.block_until_ready(mlp_with_input_skips(prep_f32, x, z))
    assert out_f32.shape == (2, 8, hidden_dim), out_f32.shape
    assert jnp.allclose(out_f32, ref, atol=1e-5, rtol=1e-5), "f32 mismatch vs reference"

    # bf16 matmul inputs / f32 accumulate + f32 epilogue (v6e/v7x MXU fast path).
    prep_bf16 = prepare_params(params, input_skips, input_dim, skip_dim, hidden_dim,
                               compute_dtype=jnp.bfloat16)
    out_bf16 = jax.block_until_ready(mlp_with_input_skips(prep_bf16, x, z))
    assert out_bf16.shape == (2, 8, hidden_dim), out_bf16.shape
    assert jnp.allclose(out_bf16, ref, atol=5e-2, rtol=5e-2), "bf16 mismatch vs reference"

    print("KERNEL_OK")
</pallas_src>

<mosaic_0001>
module attributes {stable_mosaic.version = 11 : i64} {
  func.func @kernel(%arg0: i32, %arg1: memref<16x128xf32, #tpu.memory_space<vmem>>, %arg2: memref<16x128xf32, #tpu.memory_space<vmem>>, %arg3: memref<128x128xf32, #tpu.memory_space<vmem>>, %arg4: memref<1x128xf32, #tpu.memory_space<vmem>>, %arg5: memref<128x128xf32, #tpu.memory_space<vmem>>, %arg6: memref<1x128xf32, #tpu.memory_space<vmem>>, %arg7: memref<128x128xf32, #tpu.memory_space<vmem>>, %arg8: memref<128x128xf32, #tpu.memory_space<vmem>>, %arg9: memref<1x128xf32, #tpu.memory_space<vmem>>, %arg10: memref<128x128xf32, #tpu.memory_space<vmem>>, %arg11: memref<1x128xf32, #tpu.memory_space<vmem>>, %arg12: memref<16x128xf32, #tpu.memory_space<vmem>>) attributes {dimension_semantics = [#tpu.dimension_semantics<parallel>], iteration_bounds = array<i64: 1>, scalar_prefetch = 0 : i64, scratch_operands = 0 : i64, tpu.core_type = #tpu.core_type<tc>, window_params = [{transform_indices = @transform_0, window_bounds = array<i64: 16, 128>}, {transform_indices = @transform_1, window_bounds = array<i64: 16, 128>}, {pipeline_mode = #tpu.pipeline_mode<synchronous>, transform_indices = @transform_2, window_bounds = array<i64: 128, 128>}, {pipeline_mode = #tpu.pipeline_mode<synchronous>, transform_indices = @transform_3, window_bounds = array<i64: 1, 128>}, {pipeline_mode = #tpu.pipeline_mode<synchronous>, transform_indices = @transform_4, window_bounds = array<i64: 128, 128>}, {pipeline_mode = #tpu.pipeline_mode<synchronous>, transform_indices = @transform_5, window_bounds = array<i64: 1, 128>}, {pipeline_mode = #tpu.pipeline_mode<synchronous>, transform_indices = @transform_6, window_bounds = array<i64: 128, 128>}, {pipeline_mode = #tpu.pipeline_mode<synchronous>, transform_indices = @transform_7, window_bounds = array<i64: 128, 128>}, {pipeline_mode = #tpu.pipeline_mode<synchronous>, transform_indices = @transform_8, window_bounds = array<i64: 1, 128>}, {pipeline_mode = #tpu.pipeline_mode<synchronous>, transform_indices = @transform_9, window_bounds = array<i64: 128, 128>}, {pipeline_mode = #tpu.pipeline_mode<synchronous>, transform_indices = @transform_10, window_bounds = array<i64: 1, 128>}, {transform_indices = @transform_11, window_bounds = array<i64: 16, 128>}]} {
    %c0 = arith.constant 0 : index
    %c0_0 = arith.constant 0 : index
    %0 = vector.load %arg1[%c0, %c0_0] : memref<16x128xf32, #tpu.memory_space<vmem>>, vector<16x128xf32>
    %c0_1 = arith.constant 0 : index
    %c0_2 = arith.constant 0 : index
    %1 = vector.load %arg2[%c0_1, %c0_2] : memref<16x128xf32, #tpu.memory_space<vmem>>, vector<16x128xf32>
    %c0_3 = arith.constant 0 : index
    %c0_4 = arith.constant 0 : index
    %2 = vector.load %arg3[%c0_3, %c0_4] : memref<128x128xf32, #tpu.memory_space<vmem>>, vector<128x128xf32>
    %c0_5 = arith.constant 0 : index
    %c0_6 = arith.constant 0 : index
    %3 = vector.load %arg4[%c0_5, %c0_6] : memref<1x128xf32, #tpu.memory_space<vmem>>, vector<1x128xf32>
    %cst = arith.constant dense<0.000000e+00> : vector<16x128xf32>
    %4 = tpu.matmul %0, %2, %cst {dimension_numbers = #tpu.dot_dimension_numbers<[1], [0], [0], [1], [0, 0, 1, 1], [], []>} : vector<16x128xf32>, vector<128x128xf32>, vector<16x128xf32> -> vector<16x128xf32>
    %5 = vector.broadcast %3 : vector<1x128xf32> to vector<16x128xf32>
    %6 = arith.addf %4, %5 : vector<16x128xf32>
    %cst_7 = arith.constant 0.000000e+00 : f32
    %7 = vector.broadcast %cst_7 : f32 to vector<16x128xf32>
    %8 = arith.maximumf %6, %7 : vector<16x128xf32>
    %c0_8 = arith.constant 0 : index
    %c0_9 = arith.constant 0 : index
    %9 = vector.load %arg5[%c0_8, %c0_9] : memref<128x128xf32, #tpu.memory_space<vmem>>, vector<128x128xf32>
    %c0_10 = arith.constant 0 : index
    %c0_11 = arith.constant 0 : index
    %10 = vector.load %arg6[%c0_10, %c0_11] : memref<1x128xf32, #tpu.memory_space<vmem>>, vector<1x128xf32>
    %cst_12 = arith.constant dense<0.000000e+00> : vector<16x128xf32>
    %11 = tpu.matmul %8, %9, %cst_12 {dimension_numbers = #tpu.dot_dimension_numbers<[1], [0], [0], [1], [0, 0, 1, 1], [], []>} : vector<16x128xf32>, vector<128x128xf32>, vector<16x128xf32> -> vector<16x128xf32>
    %12 = vector.broadcast %10 : vector<1x128xf32> to vector<16x128xf32>
    %13 = arith.addf %11, %12 : vector<16x128xf32>
    %cst_13 = arith.constant 0.000000e+00 : f32
    %14 = vector.broadcast %cst_13 : f32 to vector<16x128xf32>
    %15 = arith.maximumf %13, %14 : vector<16x128xf32>
    %c0_14 = arith.constant 0 : index
    %c0_15 = arith.constant 0 : index
    %16 = vector.load %arg7[%c0_14, %c0_15] : memref<128x128xf32, #tpu.memory_space<vmem>>, vector<128x128xf32>
    %c0_16 = arith.constant 0 : index
    %c0_17 = arith.constant 0 : index
    %17 = vector.load %arg8[%c0_16, %c0_17] : memref<128x128xf32, #tpu.memory_space<vmem>>, vector<128x128xf32>
    %c0_18 = arith.constant 0 : index
    %c0_19 = arith.constant 0 : index
    %18 = vector.load %arg9[%c0_18, %c0_19] : memref<1x128xf32, #tpu.memory_space<vmem>>, vector<1x128xf32>
    %cst_20 = arith.constant dense<0.000000e+00> : vector<16x128xf32>
    %19 = tpu.matmul %15, %16, %cst_20 {dimension_numbers = #tpu.dot_dimension_numbers<[1], [0], [0], [1], [0, 0, 1, 1], [], []>} : vector<16x128xf32>, vector<128x128xf32>, vector<16x128xf32> -> vector<16x128xf32>
    %cst_21 = arith.constant dense<0.000000e+00> : vector<16x128xf32>
    %20 = tpu.matmul %1, %17, %cst_21 {dimension_numbers = #tpu.dot_dimension_numbers<[1], [0], [0], [1], [0, 0, 1, 1], [], []>} : vector<16x128xf32>, vector<128x128xf32>, vector<16x128xf32> -> vector<16x128xf32>
    %21 = arith.addf %19, %20 : vector<16x128xf32>
    %22 = vector.broadcast %18 : vector<1x128xf32> to vector<16x128xf32>
    %23 = arith.addf %21, %22 : vector<16x128xf32>
    %cst_22 = arith.constant 0.000000e+00 : f32
    %24 = vector.broadcast %cst_22 : f32 to vector<16x128xf32>
    %25 = arith.maximumf %23, %24 : vector<16x128xf32>
    %c0_23 = arith.constant 0 : index
    %c0_24 = arith.constant 0 : index
    %26 = vector.load %arg10[%c0_23, %c0_24] : memref<128x128xf32, #tpu.memory_space<vmem>>, vector<128x128xf32>
    %c0_25 = arith.constant 0 : index
    %c0_26 = arith.constant 0 : index
    %27 = vector.load %arg11[%c0_25, %c0_26] : memref<1x128xf32, #tpu.memory_space<vmem>>, vector<1x128xf32>
    %cst_27 = arith.constant dense<0.000000e+00> : vector<16x128xf32>
    %28 = tpu.matmul %25, %26, %cst_27 {dimension_numbers = #tpu.dot_dimension_numbers<[1], [0], [0], [1], [0, 0, 1, 1], [], []>} : vector<16x128xf32>, vector<128x128xf32>, vector<16x128xf32> -> vector<16x128xf32>
    %29 = vector.broadcast %27 : vector<1x128xf32> to vector<16x128xf32>
    %30 = arith.addf %28, %29 : vector<16x128xf32>
    %cst_28 = arith.constant 0.000000e+00 : f32
    %31 = vector.broadcast %cst_28 : f32 to vector<16x128xf32>
    %32 = arith.maximumf %30, %31 : vector<16x128xf32>
    %c0_29 = arith.constant 0 : index
    %c0_30 = arith.constant 0 : index
    %33 = vector.load %arg12[%c0_29, %c0_30] : memref<16x128xf32, #tpu.memory_space<vmem>>, vector<16x128xf32>
    tpu.vector_store %arg12[%c0_29, %c0_30], %32 {strides = array<i32>} : memref<16x128xf32, #tpu.memory_space<vmem>>, vector<16x128xf32>,
    return
  }
  func.func @transform_0(%arg0: i32) -> (i32, i32) {
    %c0_i32 = arith.constant 0 : i32
    %c0_i32_0 = arith.constant 0 : i32
    return %arg0, %c0_i32 : i32, i32
  }
  func.func @transform_1(%arg0: i32) -> (i32, i32) {
    %c0_i32 = arith.constant 0 : i32
    %c0_i32_0 = arith.constant 0 : i32
    return %arg0, %c0_i32 : i32, i32
  }
  func.func @transform_2(%arg0: i32) -> (i32, i32) {
    %c0_i32 = arith.constant 0 : i32
    %c0_i32_0 = arith.constant 0 : i32
    %c0_i32_1 = arith.constant 0 : i32
    return %c0_i32, %c0_i32_0 : i32, i32
  }
  func.func @transform_3(%arg0: i32) -> (i32, i32) {
    %c0_i32 = arith.constant 0 : i32
    %c0_i32_0 = arith.constant 0 : i32
    %c0_i32_1 = arith.constant 0 : i32
    return %c0_i32, %c0_i32_0 : i32, i32
  }
  func.func @transform_4(%arg0: i32) -> (i32, i32) {
    %c0_i32 = arith.constant 0 : i32
    %c0_i32_0 = arith.constant 0 : i32
    %c0_i32_1 = arith.constant 0 : i32
    return %c0_i32, %c0_i32_0 : i32, i32
  }
  func.func @transform_5(%arg0: i32) -> (i32, i32) {
    %c0_i32 = arith.constant 0 : i32
    %c0_i32_0 = arith.constant 0 : i32
    %c0_i32_1 = arith.constant 0 : i32
    return %c0_i32, %c0_i32_0 : i32, i32
  }
  func.func @transform_6(%arg0: i32) -> (i32, i32) {
    %c0_i32 = arith.constant 0 : i32
    %c0_i32_0 = arith.constant 0 : i32
    %c0_i32_1 = arith.constant 0 : i32
    return %c0_i32, %c0_i32_0 : i32, i32
  }
  func.func @transform_7(%arg0: i32) -> (i32, i32) {
    %c0_i32 = arith.constant 0 : i32
    %c0_i32_0 = arith.constant 0 : i32
    %c0_i32_1 = arith.constant 0 : i32
    return %c0_i32, %c0_i32_0 : i32, i32
  }
  func.func @transform_8(%arg0: i32) -> (i32, i32) {
    %c0_i32 = arith.constant 0 : i32
    %c0_i32_0 = arith.constant 0 : i32
    %c0_i32_1 = arith.constant 0 : i32
    return %c0_i32, %c0_i32_0 : i32, i32
  }
  func.func @transform_9(%arg0: i32) -> (i32, i32) {
    %c0_i32 = arith.constant 0 : i32
    %c0_i32_0 = arith.constant 0 : i32
    %c0_i32_1 = arith.constant 0 : i32
    return %c0_i32, %c0_i32_0 : i32, i32
  }
  func.func @transform_10(%arg0: i32) -> (i32, i32) {
    %c0_i32 = arith.constant 0 : i32
    %c0_i32_0 = arith.constant 0 : i32
    %c0_i32_1 = arith.constant 0 : i32
    return %c0_i32, %c0_i32_0 : i32, i32
  }
  func.func @transform_11(%arg0: i32) -> (i32, i32) {
    %c0_i32 = arith.constant 0 : i32
    %c0_i32_0 = arith.constant 0 : i32
    return %arg0, %c0_i32 : i32, i32
  }
}

</mosaic_0001>

<bundles_post_ra>
// kernel: tpu_custom_call.1
= control target key start
LH: loop header
LB: loop body
LE: loop exit
PB: predicated region body
PF: predicated region fallthrough
CT: control target
= control target key end

     0   :  { %16 = vsyncpa [#allocation3], 0  ;;  %s759_s0 = inlined_call_operand.hbm [shape: f32[16,128], index: 0, kind: input, shape index: {}]   ;;  %s760_s1 = inlined_call_operand.hbm [shape: f32[16,128], index: 1, kind: input, shape index: {}]   ;;  %s761_s2 = inlined_call_operand.hbm [shape: f32[128,128], index: 2, kind: input, shape index: {}]   ;;  %s762_s3 = inlined_call_operand.vmem [shape: f32[1,128], index: 3, kind: input, shape index: {}]   ;;  %s763_s4 = inlined_call_operand.hbm [shape: f32[128,128], index: 4, kind: input, shape index: {}]   ;;  %s764_s5 = inlined_call_operand.vmem [shape: f32[1,128], index: 5, kind: input, shape index: {}]   ;;  %s765_s6 = inlined_call_operand.hbm [shape: f32[128,128], index: 6, kind: input, shape index: {}]   ;;  %s766_s7 = inlined_call_operand.hbm [shape: f32[128,128], index: 7, kind: input, shape index: {}]   ;;  %s767_s8 = inlined_call_operand.vmem [shape: f32[1,128], index: 8, kind: input, shape index: {}]   ;;  %s768_s9 = inlined_call_operand.hbm [shape: f32[128,128], index: 9, kind: input, shape index: {}]   ;;  %s769_s10 = inlined_call_operand.vmem [shape: f32[1,128], index: 10, kind: input, shape index: {}]   ;;  %s770_s11 = inlined_call_operand.hbm [shape: f32[16,128], index: 11, kind: output, shape index: {}]  }
   0x1   :  { %17 = vsyncpa [#allocation6], 0 }
   0x2   :  { %18 = vsyncpa [#allocation9], 0 }
   0x3   :  { %19 = vsyncpa [#allocation12], 0 }
   0x4   :  { %20 = vsyncpa [#allocation4], 0  ;;  %s38_s19 = sshll.u32 %s760_s1, 4  ;;  %s629_s20 = smov [#allocation5]   ;;  %s39_s19 = int_to_ptr.hbm [resolvable:$true] %s38_s19 }
   0x5   :  { %s40_s21 = sshll.u32 %s629_s20, 4  ;;  %s66_s24 = sshll.u32 %s763_s4, 4  ;;  %s41_s21 = int_to_ptr.vmem [resolvable:$true] %s40_s21  ;;  %s67_s24 = int_to_ptr.hbm [resolvable:$true] %s66_s24 }
   0x6   :  { %s630_s25 = smov 128   ;;  %s631_s26 = smov 8  }
   0x7   :  { %46 = dma.hbm_to_vmem [thread:$0]  %s39_s19, 256, %s41_s21, [#allocation6], %s630_s25, %s630_s25, %s631_s26  }
   0x8   :  { %s632_s27 = smov [#allocation8]   ;;  %s94_s1 = sshll.u32 %s766_s7, 4  ;;  %s95_s1 = int_to_ptr.hbm [resolvable:$true] %s94_s1 }
   0x9   :  { %s68_s28 = sshll.u32 %s632_s27, 4  ;;  %s25_s13 = sshll.u32 %s759_s0, 4  ;;  %s69_s28 = int_to_ptr.vmem [resolvable:$true] %s68_s28  ;;  %s26_s13 = int_to_ptr.hbm [resolvable:$true] %s25_s13 }
   0xa   :  { %74 = dma.hbm_to_vmem [thread:$0]  %s67_s24, 2048, %s69_s28, [#allocation9], %s630_s25, %s630_s25, %s631_s26  }
   0xb   :  { %s633_s14 = smov [#allocation11]   ;;  %s634_s16 = smov [#allocation2]  }
   0xc   :  { %s96_s15 = sshll.u32 %s633_s14, 4  ;;  %s27_s7 = sshll.u32 %s634_s16, 4  ;;  %s97_s15 = int_to_ptr.vmem [resolvable:$true] %s96_s15  ;;  %s28_s7 = int_to_ptr.vmem [resolvable:$true] %s27_s7 }
   0xd   :  { %102 = dma.hbm_to_vmem [thread:$0]  %s95_s1, 2048, %s97_s15, [#allocation12], %s630_s25, %s630_s25, %s631_s26  }
   0xe   :  { %s51_s19 = sshll.u32 %s761_s2, 4  ;;  %s81_s21 = sshll.u32 %s765_s6, 4  ;;  %s52_s19 = int_to_ptr.hbm [resolvable:$true] %s51_s19  ;;  %s82_s21 = int_to_ptr.hbm [resolvable:$true] %s81_s21 }
   0xf   :  { %33 = dma.hbm_to_vmem [thread:$0]  %s26_s13, 256, %s28_s7, [#allocation3], %s630_s25, %s630_s25, %s631_s26  }
  0x10   :  { %s635_s22 = smov [#allocation7]   ;;  %s636_s24 = smov [#allocation10]  }
  0x11   :  { %s53_s23 = sshll.u32 %s635_s22, 4  ;;  %s83_s2 = sshll.u32 %s636_s24, 4  ;;  %s54_s23 = int_to_ptr.vmem [resolvable:$true] %s53_s23  ;;  %s84_s2 = int_to_ptr.vmem [resolvable:$true] %s83_s2 }
  0x12   :  { %59 = dma.hbm_to_vmem [thread:$0]  %s52_s19, 2048, %s54_s23, [#allocation6], %s630_s25, %s630_s25, %s631_s26  }
  0x13   :  { %s109_s29 = sshll.u32 %s768_s9, 4  ;;  %s637_s6 = smov [#allocation13]   ;;  %s110_s29 = int_to_ptr.hbm [resolvable:$true] %s109_s29 }
  0x14   :  { %89 = dma.hbm_to_vmem [thread:$0]  %s82_s21, 2048, %s84_s2, [#allocation9], %s630_s25, %s630_s25, %s631_s26  }
  0x15   :  { %s111_s30 = sshll.u32 %s637_s6, 4  ;;  %s112_s30 = int_to_ptr.vmem [resolvable:$true] %s111_s30 }
  0x16   :  { %117 = dma.hbm_to_vmem [thread:$0]  %s110_s29, 2048, %s112_s30, [#allocation12], %s630_s25, %s630_s25, %s631_s26  }
  0x17   :  { %619 = dma.done.wait [#allocation3], 256  }
  0x18   :  { %620 = vsyncadd [#allocation3], 4294967040 }
  0x19   :  { %621 = dma.done.wait [#allocation6], 2304  }
  0x1a   :  { %622 = vsyncadd [#allocation6], 4294964992 }
  0x1b   :  { %623 = dma.done.wait [#allocation9], 4096  }
  0x1c   :  { %624 = vsyncadd [#allocation9], 4294963200 }
  0x1d   :  { %625 = dma.done.wait [#allocation12], 4096  }
  0x1e   :  { %626 = vsyncadd [#allocation12], 4294963200  ;;  %v167_v0 = vld [vmem:[#allocation7 + $0x78] sm:$0xff]  ;;  %v166_v1 = vld [vmem:[#allocation7 + $0x70] sm:$0xff]  ;;  %s381_s17 = sshll.u32 %s770_s11, 4  ;;  %s382_s17 = int_to_ptr.hbm [resolvable:$true] %s381_s17 }
  0x1f   :  { %172 = vmatpush.msra.mxu0 %v167_v0  ;;  %v165_v2 = vld [vmem:[#allocation7 + $0x68] sm:$0xff]  ;;  %v164_v3 = vld [vmem:[#allocation7 + $0x60] sm:$0xff]  ;;  %v163_v4 = vld [vmem:[#allocation7 + $0x58] sm:$0xff] }
  0x20   :  { %v162_v5 = vld [vmem:[#allocation7 + $0x50] sm:$0xff]  ;;  %v212_v6 = vld [vmem:[#allocation8 + $0x78] sm:$0xff]  ;;  %v161_v8 = vld [vmem:[#allocation7 + $0x48] sm:$0xff] }
  0x21   :  { %173 = vmatpush.msra.mxu0 %v166_v1  ;;  %v211_v7 = vld [vmem:[#allocation8 + $0x70] sm:$0xff]  ;;  %217 = vmatpush.msra.mxu1 %v212_v6  ;;  %v210_v9 = vld [vmem:[#allocation8 + $0x68] sm:$0xff]  ;;  %v160_v10 = vld [vmem:[#allocation7 + $0x40] sm:$0xff] }
  0x22   :  { %v209_v11 = vld [vmem:[#allocation8 + $0x60] sm:$0xff]  ;;  %v159_v12 = vld [vmem:[#allocation7 + $0x38] sm:$0xff]  ;;  %v158_v14 = vld [vmem:[#allocation7 + $0x30] sm:$0xff] }
  0x23   :  { %174 = vmatpush.msra.mxu0 %v165_v2  ;;  %218 = vmatpush.msra.mxu1 %v211_v7  ;;  %v208_v13 = vld [vmem:[#allocation8 + $0x58] sm:$0xff]  ;;  %v207_v15 = vld [vmem:[#allocation8 + $0x50] sm:$0xff]  ;;  %v157_v16 = vld [vmem:[#allocation7 + $0x28] sm:$0xff] }
  0x24   :  { %v206_v17 = vld [vmem:[#allocation8 + $0x48] sm:$0xff]  ;;  %v156_v18 = vld [vmem:[#allocation7 + $0x20] sm:$0xff]  ;;  %v155_v20 = vld [vmem:[#allocation7 + $0x18] sm:$0xff] }
  0x25   :  { %175 = vmatpush.msra.mxu0 %v164_v3  ;;  %219 = vmatpush.msra.mxu1 %v210_v9  ;;  %v205_v19 = vld [vmem:[#allocation8 + $0x40] sm:$0xff]  ;;  %v204_v21 = vld [vmem:[#allocation8 + $0x38] sm:$0xff]  ;;  %v154_v22 = vld [vmem:[#allocation7 + $0x10] sm:$0xff] }
  0x26   :  { %v203_v23 = vld [vmem:[#allocation8 + $0x30] sm:$0xff]  ;;  %v153_v24 = vld [vmem:[#allocation7 + $0x8] sm:$0xff]  ;;  %v152_v26 = vld [vmem:[#allocation7] sm:$0xff] }
  0x27   :  { %176 = vmatpush.msra.mxu0 %v163_v4  ;;  %220 = vmatpush.msra.mxu1 %v209_v11  ;;  %v202_v25 = vld [vmem:[#allocation8 + $0x28] sm:$0xff]  ;;  %v201_v27 = vld [vmem:[#allocation8 + $0x20] sm:$0xff]  ;;  %v200_v29 = vld [vmem:[#allocation8 + $0x18] sm:$0xff] }
  0x28   :  { %v148_v28 = vld [vmem:[#allocation2] sm:$0xff]  ;;  %v149_v30 = vld [vmem:[#allocation2 + $0x8] sm:$0xff]  ;;  %v199_v31 = vld [vmem:[#allocation8 + $0x10] sm:$0xff] }
  0x29   :  { %177 = vmatpush.msra.mxu0 %v162_v5  ;;  %221 = vmatpush.msra.mxu1 %v208_v13  ;;  %v198_v32 = vld [vmem:[#allocation8 + $0x8] sm:$0xff]  ;;  %v197_v33 = vld [vmem:[#allocation8] sm:$0xff]  ;;  %v273_v34 = vld [vmem:[#allocation11 + $0x78] sm:$0xff] }
  0x2a   :  { %v257_v35 = vld [vmem:[#allocation10 + $0x78] sm:$0xff]  ;;  %v272_v36 = vld [vmem:[#allocation11 + $0x70] sm:$0xff]  ;;  %275 = vmatpush.msra.mxu2 %v273_v34  ;;  %v271_v38 = vld [vmem:[#allocation11 + $0x68] sm:$0xff] }
  0x2b   :  { %178 = vmatpush.msra.mxu0 %v161_v8  ;;  %222 = vmatpush.msra.mxu1 %v207_v15  ;;  %v256_v37 = vld [vmem:[#allocation10 + $0x70] sm:$0xff]  ;;  %v255_v39 = vld [vmem:[#allocation10 + $0x68] sm:$0xff]  ;;  %v270_v40 = vld [vmem:[#allocation11 + $0x60] sm:$0xff] }
  0x2c   :  { %298 = vmatpush.msra.mxu3 %v257_v35  ;;  %276 = vmatpush.msra.mxu2 %v272_v36  ;;  %v254_v41 = vld [vmem:[#allocation10 + $0x60] sm:$0xff]  ;;  %v269_v42 = vld [vmem:[#allocation11 + $0x58] sm:$0xff]  ;;  %v268_v44 = vld [vmem:[#allocation11 + $0x50] sm:$0xff] }
  0x2d   :  { %179 = vmatpush.msra.mxu0 %v160_v10  ;;  %223 = vmatpush.msra.mxu1 %v206_v17  ;;  %v253_v43 = vld [vmem:[#allocation10 + $0x58] sm:$0xff]  ;;  %v252_v45 = vld [vmem:[#allocation10 + $0x50] sm:$0xff]  ;;  %v267_v46 = vld [vmem:[#allocation11 + $0x48] sm:$0xff] }
  0x2e   :  { %299 = vmatpush.msra.mxu3 %v256_v37  ;;  %277 = vmatpush.msra.mxu2 %v271_v38  ;;  %v251_v47 = vld [vmem:[#allocation10 + $0x48] sm:$0xff]  ;;  %v266_v48 = vld [vmem:[#allocation11 + $0x40] sm:$0xff]  ;;  %v265_v50 = vld [vmem:[#allocation11 + $0x38] sm:$0xff] }
  0x2f   :  { %180 = vmatpush.msra.mxu0 %v159_v12  ;;  %224 = vmatpush.msra.mxu1 %v205_v19  ;;  %v250_v49 = vld [vmem:[#allocation10 + $0x40] sm:$0xff]  ;;  %v249_v51 = vld [vmem:[#allocation10 + $0x38] sm:$0xff]  ;;  %v264_v53 = vld [vmem:[#allocation11 + $0x30] sm:$0xff] }
  0x30   :  { %300 = vmatpush.msra.mxu3 %v255_v39  ;;  %278 = vmatpush.msra.mxu2 %v270_v40  ;;  %v423_v52 = vld [vmem:[%s762_s3] ss:$0 sm:$0xff]  ;;  %v248_v54 = vld [vmem:[#allocation10 + $0x30] sm:$0xff]  ;;  %v263_v55 = vld [vmem:[#allocation11 + $0x28] sm:$0xff] }
  0x31   :  { %181 = vmatpush.msra.mxu0 %v158_v14  ;;  %225 = vmatpush.msra.mxu1 %v204_v21  ;;  %v247_v56 = vld [vmem:[#allocation10 + $0x28] sm:$0xff]  ;;  %v262_v59 = vld [vmem:[#allocation11 + $0x20] sm:$0xff]  ;;  %v261_v62 = vld [vmem:[#allocation11 + $0x18] sm:$0xff] }
  0x32   :  { %301 = vmatpush.msra.mxu3 %v254_v41  ;;  %279 = vmatpush.msra.mxu2 %v269_v42  ;;  %v246_v60 = vld [vmem:[#allocation10 + $0x20] sm:$0xff]  ;;  %v245_v63 = vld [vmem:[#allocation10 + $0x18] sm:$0xff]  ;;  %v260_v3 = vld [vmem:[#allocation11 + $0x10] sm:$0xff] }
  0x33   :  { %182 = vmatpush.msra.mxu0 %v157_v16  ;;  %226 = vmatpush.msra.mxu1 %v203_v23  ;;  %v244_v4 = vld [vmem:[#allocation10 + $0x10] sm:$0xff]  ;;  %v259_v5 = vld [vmem:[#allocation11 + $0x8] sm:$0xff]  ;;  %v258_v7 = vld [vmem:[#allocation11] sm:$0xff] }
  0x34   :  { %302 = vmatpush.msra.mxu3 %v253_v43  ;;  %280 = vmatpush.msra.mxu2 %v268_v44  ;;  %v243_v6 = vld [vmem:[#allocation10 + $0x8] sm:$0xff]  ;;  %v242_v8 = vld [vmem:[#allocation10] sm:$0xff]  ;;  %v150_v9 = vld [vmem:[#allocation5] sm:$0xff] }
  0x35   :  { %183 = vmatpush.msra.mxu0 %v156_v18  ;;  %227 = vmatpush.msra.mxu1 %v202_v25  ;;  %v151_v10 = vld [vmem:[#allocation5 + $0x8] sm:$0xff]  ;;  %v342_v12 = vld [vmem:[#allocation13 + $0x70] sm:$0xff]  ;;  %v341_v13 = vld [vmem:[#allocation13 + $0x68] sm:$0xff] }
  0x36   :  { %303 = vmatpush.msra.mxu3 %v252_v45  ;;  %281 = vmatpush.msra.mxu2 %v267_v46  ;;  %v343_v11 = vld [vmem:[#allocation13 + $0x78] sm:$0xff]  ;;  %v340_v14 = vld [vmem:[#allocation13 + $0x60] sm:$0xff]  ;;  %v338_v16 = vld [vmem:[#allocation13 + $0x50] sm:$0xff] }
  0x37   :  { %184 = vmatpush.msra.mxu0 %v155_v20  ;;  %228 = vmatpush.msra.mxu1 %v201_v27  ;;  %v339_v15 = vld [vmem:[#allocation13 + $0x58] sm:$0xff]  ;;  %v337_v17 = vld [vmem:[#allocation13 + $0x48] sm:$0xff]  ;;  %v336_v18 = vld [vmem:[#allocation13 + $0x40] sm:$0xff] }
  0x38   :  { %304 = vmatpush.msra.mxu3 %v251_v47  ;;  %282 = vmatpush.msra.mxu2 %v266_v48  ;;  %v335_v19 = vld [vmem:[#allocation13 + $0x38] sm:$0xff]  ;;  %v424_v20 = vld [vmem:[%s764_s5] ss:$0 sm:$0xff]  ;;  %v334_v21 = vld [vmem:[#allocation13 + $0x30] sm:$0xff] }
  0x39   :  { %185 = vmatpush.msra.mxu0 %v154_v22  ;;  %229 = vmatpush.msra.mxu1 %v200_v29  ;;  %v333_v22 = vld [vmem:[#allocation13 + $0x28] sm:$0xff]  ;;  %v332_v25 = vld [vmem:[#allocation13 + $0x20] sm:$0xff] }
  0x3a   :  { %305 = vmatpush.msra.mxu3 %v250_v49  ;;  %283 = vmatpush.msra.mxu2 %v265_v50  ;;  %v425_v35 = vld [vmem:[%s767_s8] ss:$0 sm:$0xff]  ;;  %s638_s8 = smov [#allocation14]  }
  0x3b   :  { %186 = vmatpush.msra.mxu0 %v153_v24  ;;  %230 = vmatpush.msra.mxu1 %v199_v31  ;;  %v330_v31 = vld [vmem:[#allocation13 + $0x10] sm:$0xff]  ;;  %v426_v45 = vld [vmem:[%s769_s10] ss:$0 sm:$0xff]  ;;  %s379_s15 = sshll.u32 %s638_s8, 4  ;;  %s380_s15 = int_to_ptr.vmem [resolvable:$true] %s379_s15 }
  0x3c   :  { %306 = vmatpush.msra.mxu3 %v249_v51  ;;  %284 = vmatpush.msra.mxu2 %v264_v53 }
  0x3d   :  { %187 = vmatpush.msra.mxu0 %v152_v26  ;;  %231 = vmatpush.msra.mxu1 %v198_v32  ;;  %v329_v32 = vld [vmem:[#allocation13 + $0x8] sm:$0xff] }
  0x3e   :  { %188 = vmatmul.f32.vlgmr.msra.gmra.mxu0 %v148_v28  ;;  %307 = vmatpush.msra.mxu3 %v248_v54 }
  0x3f   :  { %232 = vmatpush.msra.mxu1 %v197_v33  ;;  %285 = vmatpush.msra.mxu2 %v263_v55  ;;  %v328_v33 = vld [vmem:[#allocation13] sm:$0xff] }
  0x40   :  { %308 = vmatpush.msra.mxu3 %v247_v56  ;;  %348 = vmatpush.msrb.mxu0 %v343_v11 }
  0x41   :  { %286 = vmatpush.msra.mxu2 %v262_v59  ;;  %397 = vmatpush.msrb.mxu1 %v343_v11 }
  0x42   :  { %309 = vmatpush.msra.mxu3 %v246_v60  ;;  %349 = vmatpush.msrb.mxu0 %v342_v12 }
  0x43   :  { %287 = vmatpush.msra.mxu2 %v261_v62  ;;  %398 = vmatpush.msrb.mxu1 %v342_v12 }
  0x44   :  { %310 = vmatpush.msra.mxu3 %v245_v63  ;;  %350 = vmatpush.msrb.mxu0 %v341_v13 }
  0x45   :  { %288 = vmatpush.msra.mxu2 %v260_v3  ;;  %399 = vmatpush.msrb.mxu1 %v341_v13 }
  0x46   :  { %191 = vmatmul.f32.gmra.mxu0 %v149_v30  ;;  %311 = vmatpush.msra.mxu3 %v244_v4  ;;  %v331_v30 = vld [vmem:[#allocation13 + $0x18] sm:$0xff] }
  0x47   :  { %289 = vmatpush.msra.mxu2 %v259_v5  ;;  %351 = vmatpush.msrb.mxu0 %v340_v14 }
  0x48   :  { %312 = vmatpush.msra.mxu3 %v243_v6  ;;  %400 = vmatpush.msrb.mxu1 %v340_v14 }
  0x49   :  { %290 = vmatpush.msra.mxu2 %v258_v7  ;;  %352 = vmatpush.msrb.mxu0 %v339_v15 }
  0x4a   :  { %313 = vmatpush.msra.mxu3 %v242_v8  ;;  %291 = vmatmul.f32.vlgmr.msra.gmra.mxu2 %v150_v9 }
  0x4b   :  { %401 = vmatpush.msrb.mxu1 %v339_v15  ;;  %353 = vmatpush.msrb.mxu0 %v338_v16 }
  0x4d   :  { %402 = vmatpush.msrb.mxu1 %v338_v16  ;;  %354 = vmatpush.msrb.mxu0 %v337_v17 }
  0x4f   :  { %403 = vmatpush.msrb.mxu1 %v337_v17  ;;  %355 = vmatpush.msrb.mxu0 %v336_v18 }
  0x51   :  { %404 = vmatpush.msrb.mxu1 %v336_v18  ;;  %356 = vmatpush.msrb.mxu0 %v335_v19 }
  0x52   :  { %294 = vmatmul.f32.gmra.mxu2 %v151_v10 }
  0x53   :  { %405 = vmatpush.msrb.mxu1 %v335_v19  ;;  %357 = vmatpush.msrb.mxu0 %v334_v21 }
  0x55   :  { %406 = vmatpush.msrb.mxu1 %v334_v21  ;;  %358 = vmatpush.msrb.mxu0 %v333_v22 }
  0x57   :  { %407 = vmatpush.msrb.mxu1 %v333_v22  ;;  %359 = vmatpush.msrb.mxu0 %v332_v25 }
  0x59   :  { %408 = vmatpush.msrb.mxu1 %v332_v25  ;;  %360 = vmatpush.msrb.mxu0 %v331_v30 }
  0x5b   :  { %409 = vmatpush.msrb.mxu1 %v331_v30  ;;  %361 = vmatpush.msrb.mxu0 %v330_v31 }
  0x5d   :  { %410 = vmatpush.msrb.mxu1 %v330_v31  ;;  %362 = vmatpush.msrb.mxu0 %v329_v32 }
  0x5f   :  { %411 = vmatpush.msrb.mxu1 %v329_v32  ;;  %363 = vmatpush.msrb.mxu0 %v328_v33 }
  0x61   :  { %412 = vmatpush.msrb.mxu1 %v328_v33 }
  0xbb   :  { %v189_v57 = vpop.f32.mrf.mxu0 }
  0xbc   :  { %v190_v58 = vadd.f32 %v423_v52, %v189_v57 }
  0xbe   :  { %v195_v61 = vmax.f32 %v190_v58, 0.0 }
  0xc0   :  { %233 = vmatmul.f32.vlgmr.msra.gmra.mxu1 %v195_v61 }
  0xc3   :  { %v192_v0 = vpop.f32.mrf.mxu0 }
  0xc4   :  { %v193_v1 = vadd.f32 %v423_v52, %v192_v0 }
  0xc6   :  { %v196_v2 = vmax.f32 %v193_v1, 0.0 }
  0xc8   :  { %236 = vmatmul.f32.gmra.mxu1 %v196_v2 }
  0xcd   :  { %v292_v34 = vpop.f32.mrf.mxu2 }
  0xd5   :  { %v295_v40 = vpop.f32.mrf.mxu2 }
 0x13d   :  { %v234_v23 = vpop.f32.mrf.mxu1 }
 0x13e   :  { %v235_v24 = vadd.f32 %v424_v20, %v234_v23 }
 0x140   :  { %v240_v26 = vmax.f32 %v235_v24, 0.0 }
 0x142   :  { %314 = vmatmul.f32.vlgmr.msra.gmra.mxu3 %v240_v26 }
 0x145   :  { %v237_v27 = vpop.f32.mrf.mxu1 }
 0x146   :  { %v238_v28 = vadd.f32 %v424_v20, %v237_v27 }
 0x148   :  { %v241_v29 = vmax.f32 %v238_v28, 0.0 }
 0x14a   :  { %317 = vmatmul.f32.gmra.mxu3 %v241_v29 }
 0x1c5   :  { %v315_v36 = vpop.f32.mrf.mxu3 }
 0x1c6   :  { %v316_v37 = vadd.f32 %v315_v36, %v292_v34 }
 0x1c8   :  { %v324_v38 = vadd.f32 %v425_v35, %v316_v37 }
 0x1ca   :  { %v326_v39 = vmax.f32 %v324_v38, 0.0 }
 0x1cc   :  { %364 = vmatmul.f32.vlgmr.msrb.gmra.mxu0 %v326_v39 }
 0x1cd   :  { %v318_v41 = vpop.f32.mrf.mxu3 }
 0x1ce   :  { %v319_v42 = vadd.f32 %v318_v41, %v295_v40 }
 0x1d0   :  { %v325_v43 = vadd.f32 %v425_v35, %v319_v42 }
 0x1d2   :  { %v327_v44 = vmax.f32 %v325_v43, 0.0 }
 0x1d4   :  { %367 = vmatmul.f32.vlgmr.msrb.gmra.mxu1 %v327_v44 }
 0x249   :  { %v365_v46 = vpop.f32.mrf.mxu0 }
 0x24a   :  { %v366_v47 = vadd.f32 %v426_v45, %v365_v46 }
 0x24c   :  { %v371_v48 = vmax.f32 %v366_v47, 0.0 }
 0x24e   :  { %373 = vst [vmem:[#allocation14] sm:$0xff] %v371_v48 }
 0x251   :  { %v368_v49 = vpop.f32.mrf.mxu1 }
 0x252   :  { %v369_v50 = vadd.f32 %v426_v45, %v368_v49 }
 0x254   :  { %v372_v51 = vmax.f32 %v369_v50, 0.0 }
 0x256   :  { %374 = vst [vmem:[#allocation14 + $0x8] sm:$0xff] %v372_v51 }
 0x257   :  { %387 = dma.vmem_to_hbm [thread:$0]  %s380_s15, 256, %s382_s17, [#allocation4], %s630_s25, %s630_s25, %s631_s26  }
 0x258   :  { %627 = dma.done.wait [#allocation4], 256  }
 0x259   :  { %628 = vsyncadd [#allocation4], 4294967040 }
 0x25a   :  { %392 = vsyncpa [#allocation3], 1 }
 0x25b   :  { %393 = vsyncpa [#allocation6], 1 }
 0x25c   :  { %394 = vsyncpa [#allocation9], 1 }
 0x25d   :  { %395 = vsyncpa [#allocation12], 1 }
 0x25e   :  { %396 = vsyncpa [#allocation4], 1 }

</bundles_post_ra>
